<compile_context>
chip_gen: v5e
topology: v5e:2x2
jax: 0.10.0
libtpu: 0.0.40
codegen_flags: <defaults>
</compile_context>

<pallas_src>
import functools

import jax
import jax.numpy as jnp
import numpy as np
from jax.experimental import pallas as pl
from jax.experimental.pallas import tpu as pltpu


def _round_up(x, m):
    return ((x + m - 1) // m) * m


def _cdiv(a, b):
    return (a + b - 1) // b


def _vmem_capacity_bytes():
    try:
        return int(pltpu.get_tpu_info().vmem_capacity_bytes)
    except Exception:
        return 64 * 1024 * 1024  # conservative fallback: v7x per-TensorCore VMEM


def _default_num_slices():
    # 2 TensorCores per chip on v7x; 1 on v5e/v6e.  The "parallel" slice axis
    # only helps with >1 core and would otherwise just add a padded tile.
    try:
        kind = jax.devices()[0].device_kind.lower()
    except Exception:
        return 1
    return 2 if "v7" in kind else 1


def _per_row_vmem_bytes(c, itemsize):
    # Double-buffered logits tile (lanes padded to 128) + double-buffered
    # packed (label, weight) column (its width-2 last dim lane-pads to 128).
    c_pad = _round_up(max(c, 1), 128)
    return 2 * c_pad * itemsize + 2 * 128 * 4


def _auto_block_n(n, c, itemsize, vmem_cap):
    """Largest row tile whose double-buffered footprint fits the VMEM budget."""
    per_row = _per_row_vmem_bytes(c, itemsize)
    budget = int(vmem_cap * 0.7) - (4 << 20)     # headroom for Mosaic scratch
    bn = max(8, budget // per_row)
    bn = min((bn // 8) * 8, 65536)
    return max(8, min(bn, _round_up(n, 8)))


def _ce_loss_kernel(logits_ref, meta_ref, partial_ref, *,
                    n_rows, block_n, tiles_per_slice):
    # logits_ref : (block_n, C)  logits tile (f32 or bf16; cast in-kernel)
    # meta_ref   : (block_n, 2)  f32: [:,0] = label (exact small int), [:,1] = w[y]
    # partial_ref: (1, 1, 1)     per-slice partial loss (resident accumulator)
    s = pl.program_id(0)   # slice (parallel across TensorCores on v7x)
    j = pl.program_id(1)   # tile within slice (sequential reduction)

    @pl.when(j == 0)
    def _init():
        partial_ref[...] = jnp.zeros_like(partial_ref)

    x = logits_ref[...].astype(jnp.float32)                 # (bn, C)
    meta = meta_ref[...]                                    # (bn, 2)
    labels = meta[:, 0:1].astype(jnp.int32)                 # (bn, 1)
    w_y = meta[:, 1:2]                                      # (bn, 1)
    bn, c = x.shape

    # Max-shifted logits; lane reductions only cover the true C classes
    # (Mosaic masks the lane padding), so no class-axis masking is needed.
    m = jnp.max(x, axis=1, keepdims=True)                   # (bn, 1)
    xm = x - m                                              # (bn, C)
    se = jnp.sum(jnp.exp(xm), axis=1, keepdims=True)        # (bn, 1)

    # Target-logit gather (relative to the row max) via one select + reduce.
    # Note: if a bundle dump shows VALU saturated at large C (v7x/bf16), these
    # two lane reductions could be offloaded to the idle MXU via a ones-column dot.
    idx = jax.lax.broadcasted_iota(jnp.int32, (bn, c), 1)
    tgt_m = jnp.sum(jnp.where(idx == labels, xm, 0.0),
                    axis=1, keepdims=True)                  # (bn, 1) = x[y] - m

    # w[y] * (logsumexp(x) - x[y]) == w[y] * (log(se) - (x[y] - m))
    per_row = w_y * (jnp.log(se) - tgt_m)                   # (bn, 1)

    # Drop rows past the true batch size (tail block / padded grid steps).
    # Any NaN/Inf those garbage rows produced never reaches the sum (vselect).
    row0 = (s * tiles_per_slice + j) * block_n
    rows = row0 + jax.lax.broadcasted_iota(jnp.int32, (bn, 1), 0)
    masked = jnp.where(rows < n_rows, per_row, 0.0)

    partial_ref[...] += jnp.sum(masked)


def ce_loss_pallas(outputs, targets, class_weights=None, *,
                   block_n=None, num_slices=None):
    """Weighted cross-entropy, reduction='sum'.

    outputs: (N, C) float (f32 or bf16); targets: (N, C) scores (argmax -> label);
    class_weights: (C,) or None.
    """
    n, c = outputs.shape
    if class_weights is None:
        class_weights = jnp.ones((c,), jnp.float32)
    w = jnp.asarray(class_weights, jnp.float32).reshape(c)

    # argmax(targets) and the class-weight gather run once in the wrapper, so
    # the kernel streams only the (N, C) logits plus a tiny packed (N, 2) column.
    labels = jnp.argmax(targets, axis=1).astype(jnp.int32)              # (N,)
    meta = jnp.stack([labels.astype(jnp.float32), w[labels]], axis=1)   # (N, 2) f32

    itemsize = jnp.dtype(outputs.dtype).itemsize
    vmem_cap = _vmem_capacity_bytes()
    if block_n is None:
        block_n = _auto_block_n(n, c, itemsize, vmem_cap)
    block_n = max(8, (block_n // 8) * 8)

    n_tiles = _cdiv(n, block_n)
    if num_slices is None:
        num_slices = _default_num_slices()
    num_slices = max(1, min(num_slices, n_tiles))
    tiles_per_slice = _cdiv(n_tiles, num_slices)

    vmem_needed = block_n * _per_row_vmem_bytes(c, itemsize) + (4 << 20)
    vmem_limit = int(min(max(vmem_needed, 32 << 20), int(vmem_cap * 0.85)))

    def row_block_map(s, j):
        # Padded grid steps clamp to the slice's previous tile: same block index
        # as the prior step -> Pallas skips the DMA; those rows are masked anyway.
        t = s * tiles_per_slice + j
        return (jnp.minimum(t, n_tiles - 1), 0)

    kernel = functools.partial(
        _ce_loss_kernel, n_rows=n, block_n=block_n,
        tiles_per_slice=tiles_per_slice)

    partials = pl.pallas_call(
        kernel,
        out_shape=jax.ShapeDtypeStruct((num_slices, 1, 1), jnp.float32),
        grid_spec=pltpu.PrefetchScalarGridSpec(
            num_scalar_prefetch=0,
            grid=(num_slices, tiles_per_slice),
            in_specs=[
                pl.BlockSpec((block_n, c), row_block_map),   # logits tile
                pl.BlockSpec((block_n, 2), row_block_map),   # packed label + weight
            ],
            out_specs=pl.BlockSpec((1, 1, 1), lambda s, j: (s, 0, 0)),
        ),
        compiler_params=pltpu.CompilerParams(
            dimension_semantics=("parallel", "arbitrary"),
            vmem_limit_bytes=vmem_limit,
        ),
    )(outputs, meta)
    return jnp.sum(partials)


def ce_loss_reference(outputs, targets, class_weights):
    y = jnp.argmax(targets, axis=1)
    o = outputs.astype(jnp.float32)
    lse = jax.nn.logsumexp(o, axis=1)
    tgt = jnp.take_along_axis(o, y[:, None], axis=1)[:, 0]
    return jnp.sum(class_weights[y] * (lse - tgt))


if __name__ == "__main__":
    key = jax.random.PRNGKey(0)
    k1, k2, k3, k4, k5, k6 = jax.random.split(key, 6)

    C = 10
    class_weights = (jnp.arange(C, dtype=jnp.float32) * 0.1) + 0.5

    def check(outputs, targets, weights, **kw):
        loss = jax.block_until_ready(ce_loss_pallas(outputs, targets, weights, **kw))
        ref = jax.block_until_ready(ce_loss_reference(outputs, targets, weights))
        assert np.allclose(np.asarray(loss), np.asarray(ref),
                           rtol=1e-5, atol=1e-4), (loss, ref)

    # 1) simple f32 case, auto tile size / auto num_slices.
    N = 16
    outputs = jax.random.normal(k1, (N, C), dtype=jnp.float32)
    labels = jax.random.randint(k2, (N,), 0, C)
    targets = jax.nn.one_hot(labels, C, dtype=jnp.float32)
    check(outputs, targets, class_weights)

    # 2) ragged N across two slices (row masking on a partial tail block).
    N2 = 13
    outputs2 = jax.random.normal(k3, (N2, C), dtype=jnp.float32)
    labels2 = jax.random.randint(k4, (N2,), 0, C)
    targets2 = jax.nn.one_hot(labels2, C, dtype=jnp.float32)
    check(outputs2, targets2, class_weights, block_n=8, num_slices=2)

    # 3) odd tile count with a fully clamped (masked, DMA-skipped) pad tile.
    N3 = 24
    outputs3 = jax.random.normal(k1, (N3, C), dtype=jnp.float32)
    labels3 = jax.random.randint(k2, (N3,), 0, C)
    targets3 = jax.nn.one_hot(labels3, C, dtype=jnp.float32)
    check(outputs3, targets3, class_weights, block_n=8, num_slices=2)

    # 4) bf16 logits read directly (cast to f32 inside the kernel).
    check(outputs.astype(jnp.bfloat16), targets, class_weights)

    # 5) wider class axis (> one vreg of lanes, non-multiple of 128).
    N4, C4 = 32, 300
    w4 = 0.25 + jax.random.uniform(k5, (C4,), dtype=jnp.float32)
    outputs4 = jax.random.normal(k6, (N4, C4), dtype=jnp.float32)
    labels4 = jax.random.randint(k2, (N4,), 0, C4)
    targets4 = jax.nn.one_hot(labels4, C4, dtype=jnp.float32)
    check(outputs4, targets4, w4)

    print("KERNEL_OK")
</pallas_src>

<mosaic_0001>
module attributes {stable_mosaic.version = 11 : i64} {
  func.func @_ce_loss_kernel(%arg0: i32, %arg1: i32, %arg2: memref<16x10xf32, #tpu.memory_space<vmem>>, %arg3: memref<16x2xf32, #tpu.memory_space<vmem>>, %arg4: memref<1x1x1xf32, #tpu.memory_space<vmem>>) attributes {dimension_semantics = [#tpu.dimension_semantics<parallel>, #tpu.dimension_semantics<arbitrary>], iteration_bounds = array<i64: 1, 1>, scalar_prefetch = 0 : i64, scratch_operands = 0 : i64, tpu.core_type = #tpu.core_type<tc>, window_params = [{transform_indices = @transform_0, window_bounds = array<i64: 16, 10>}, {transform_indices = @transform_1, window_bounds = array<i64: 16, 2>}, {transform_indices = @transform_2, window_bounds = array<i64: 1, 1, 1>}]} {
    %c0_i32 = arith.constant 0 : i32
    %0 = arith.cmpi eq, %arg1, %c0_i32 : i32
    %1 = arith.extui %0 : i1 to i32
    %c0_i32_0 = arith.constant 0 : i32
    %2 = arith.cmpi ne, %1, %c0_i32_0 : i32
    scf.if %2 {
      %cst_16 = arith.constant 0.000000e+00 : f32
      %43 = vector.broadcast %cst_16 : f32 to vector<1x1x1xf32>
      %c0_17 = arith.constant 0 : index
      %c0_18 = arith.constant 0 : index
      %c0_19 = arith.constant 0 : index
      %44 = vector.load %arg4[%c0_17, %c0_18, %c0_19] : memref<1x1x1xf32, #tpu.memory_space<vmem>>, vector<1x1x1xf32>
      tpu.vector_store %arg4[%c0_17, %c0_18, %c0_19], %43 {strides = array<i32>} : memref<1x1x1xf32, #tpu.memory_space<vmem>>, vector<1x1x1xf32>,
    } else {
    }
    %c0 = arith.constant 0 : index
    %c0_1 = arith.constant 0 : index
    %3 = vector.load %arg2[%c0, %c0_1] : memref<16x10xf32, #tpu.memory_space<vmem>>, vector<16x10xf32>
    %c0_2 = arith.constant 0 : index
    %c0_3 = arith.constant 0 : index
    %4 = vector.load %arg3[%c0_2, %c0_3] : memref<16x2xf32, #tpu.memory_space<vmem>>, vector<16x2xf32>
    %5 = vector.extract_strided_slice %4 {offsets = [0, 0], sizes = [16, 1], strides = [1, 1]} : vector<16x2xf32> to vector<16x1xf32>
    %6 = arith.fptosi %5 : vector<16x1xf32> to vector<16x1xi32>
    %7 = vector.extract_strided_slice %4 {offsets = [0, 1], sizes = [16, 1], strides = [1, 1]} : vector<16x2xf32> to vector<16x1xf32>
    %cst = arith.constant dense<0xFF800000> : vector<16xf32>
    %8 = vector.multi_reduction <maximumf>, %3, %cst [1] : vector<16x10xf32> to vector<16xf32>
    %9 = vector.shape_cast %8 : vector<16xf32> to vector<16x1xf32>
    %10 = vector.broadcast %9 : vector<16x1xf32> to vector<16x10xf32>
    %11 = arith.subf %3, %10 : vector<16x10xf32>
    %12 = math.exp %11 : vector<16x10xf32>
    %cst_4 = arith.constant dense<0.000000e+00> : vector<16xf32>
    %13 = vector.multi_reduction <add>, %12, %cst_4 [1] : vector<16x10xf32> to vector<16xf32>
    %14 = vector.shape_cast %13 : vector<16xf32> to vector<16x1xf32>
    %15 = tpu.iota {dimensions = array<i32: 1>} : vector<16x10xi32>
    %16 = vector.broadcast %6 : vector<16x1xi32> to vector<16x10xi32>
    %17 = arith.cmpi eq, %15, %16 : vector<16x10xi32>
    %cst_5 = arith.constant 0.000000e+00 : f32
    %18 = vector.broadcast %cst_5 : f32 to vector<16x10xf32>
    %19 = arith.select %17, %11, %18 : vector<16x10xi1>, vector<16x10xf32>
    %cst_6 = arith.constant dense<0.000000e+00> : vector<16xf32>
    %20 = vector.multi_reduction <add>, %19, %cst_6 [1] : vector<16x10xf32> to vector<16xf32>
    %21 = vector.shape_cast %20 : vector<16xf32> to vector<16x1xf32>
    %22 = math.log %14 : vector<16x1xf32>
    %23 = arith.subf %22, %21 : vector<16x1xf32>
    %24 = arith.mulf %7, %23 : vector<16x1xf32>
    %c1_i32 = arith.constant 1 : i32
    %25 = arith.muli %arg0, %c1_i32 : i32
    %26 = arith.addi %25, %arg1 : i32
    %c16_i32 = arith.constant 16 : i32
    %27 = arith.muli %26, %c16_i32 : i32
    %28 = tpu.iota {dimensions = array<i32: 0>} : vector<16x1xi32>
    %29 = vector.broadcast %27 : i32 to vector<16x1xi32>
    %30 = arith.addi %29, %28 : vector<16x1xi32>
    %c16_i32_7 = arith.constant 16 : i32
    %31 = vector.broadcast %c16_i32_7 : i32 to vector<16x1xi32>
    %32 = arith.cmpi slt, %30, %31 : vector<16x1xi32>
    %cst_8 = arith.constant 0.000000e+00 : f32
    %33 = vector.broadcast %cst_8 : f32 to vector<16x1xf32>
    %34 = arith.select %32, %24, %33 : vector<16x1xi1>, vector<16x1xf32>
    %c0_9 = arith.constant 0 : index
    %c0_10 = arith.constant 0 : index
    %c0_11 = arith.constant 0 : index
    %35 = vector.load %arg4[%c0_9, %c0_10, %c0_11] : memref<1x1x1xf32, #tpu.memory_space<vmem>>, vector<1x1x1xf32>
    %36 = vector.shape_cast %34 : vector<16x1xf32> to vector<1x16x1xf32>
    %cst_12 = arith.constant dense<0.000000e+00> : vector<1xf32>
    %37 = vector.multi_reduction <add>, %36, %cst_12 [1, 2] : vector<1x16x1xf32> to vector<1xf32>
    %38 = vector.shape_cast %37 : vector<1xf32> to vector<1x1x1xf32>
    %39 = vector.extract %38[0, 0, 0] : f32 from vector<1x1x1xf32>
    %40 = vector.broadcast %39 : f32 to vector<1x1x1xf32>
    %41 = arith.addf %35, %40 : vector<1x1x1xf32>
    %c0_13 = arith.constant 0 : index
    %c0_14 = arith.constant 0 : index
    %c0_15 = arith.constant 0 : index
    %42 = vector.load %arg4[%c0_13, %c0_14, %c0_15] : memref<1x1x1xf32, #tpu.memory_space<vmem>>, vector<1x1x1xf32>
    tpu.vector_store %arg4[%c0_13, %c0_14, %c0_15], %41 {strides = array<i32>} : memref<1x1x1xf32, #tpu.memory_space<vmem>>, vector<1x1x1xf32>,
    return
  }
  func.func @transform_0(%arg0: i32, %arg1: i32) -> (i32, i32) {
    %c1_i32 = arith.constant 1 : i32
    %0 = arith.muli %arg0, %c1_i32 : i32
    %1 = arith.addi %0, %arg1 : i32
    %c0_i32 = arith.constant 0 : i32
    %2 = arith.minsi %1, %c0_i32 : i32
    %c0_i32_0 = arith.constant 0 : i32
    %c0_i32_1 = arith.constant 0 : i32
    return %2, %c0_i32_0 : i32, i32
  }
  func.func @transform_1(%arg0: i32, %arg1: i32) -> (i32, i32) {
    %c1_i32 = arith.constant 1 : i32
    %0 = arith.muli %arg0, %c1_i32 : i32
    %1 = arith.addi %0, %arg1 : i32
    %c0_i32 = arith.constant 0 : i32
    %2 = arith.minsi %1, %c0_i32 : i32
    %c0_i32_0 = arith.constant 0 : i32
    %c0_i32_1 = arith.constant 0 : i32
    return %2, %c0_i32_0 : i32, i32
  }
  func.func @transform_2(%arg0: i32, %arg1: i32) -> (i32, i32, i32) {
    %c0_i32 = arith.constant 0 : i32
    %c0_i32_0 = arith.constant 0 : i32
    %c0_i32_1 = arith.constant 0 : i32
    return %arg0, %c0_i32, %c0_i32_0 : i32, i32, i32
  }
}

</mosaic_0001>

<bundles_post_ra>
// kernel: tpu_custom_call.1
= control target key start
LH: loop header
LB: loop body
LE: loop exit
PB: predicated region body
PF: predicated region fallthrough
CT: control target
= control target key end

     0   :  { %vm88_vm0 = vcmask 80896   ;;  %v251_v3 = vmov 0   ;;  %s293_s0 = inlined_call_operand.vmem [shape: f32[16,10], index: 0, kind: input, shape index: {}]   ;;  %s294_s1 = inlined_call_operand.vmem [shape: f32[16,2], index: 1, kind: input, shape index: {}]   ;;  %s295_s2 = inlined_call_operand.hbm [shape: f32[1,1,1], index: 2, kind: output, shape index: {}]  }
   0x1   :  { %v82_v0 = vld [vmem:[%s293_s0] sm:$0xff]  ;;  %215 = vset.pattern.permute.xlu1 %v251_v3  ;;  %v85_v6 = vld [vmem:[%s294_s1 + $0x8] sm:$0xff]  ;;  %216 = vset.pattern.permute.xlu0 %v251_v3 }
   0x2   :  { %v84_v1 = vld [vmem:[%s294_s1] sm:$0xff]  ;;  %v89_v2 = vsel %vm88_vm0, %v82_v0, -inf }
   0x3   :  { %vm199_vm1 = vcmp.lt.s32.totalorder %v84_v1, 0  ;;  %v200_v4 = vceil.f32 %v84_v1  ;;  %v201_v5 = vfloor.f32 %v84_v1 }
   0x4   :  { %7 = vsyncpa [#allocation3], 0  ;;  %90 = vmax.xlane.f32.xlu0 %v89_v2  ;;  %v205_v8 = vceil.f32 %v85_v6  ;;  %v206_v9 = vfloor.f32 %v85_v6  ;;  %v83_v11 = vld [vmem:[%s293_s0 + $0x8] sm:$0xff]  ;;  %vm204_vm2 = vcmp.lt.s32.totalorder %v85_v6, 0  ;;  %v107_v15 = vlaneseq  ;;  %s252_s0 = smov 127   ;;  %s254_s1 = smov [#allocation2]  }
   0x5   :  { %v202_v7 = vsel %vm199_vm1, %v200_v4, %v201_v5  ;;  %v92_v12 = vsel %vm88_vm0, %v83_v11, -inf  ;;  %vm154_vm5 = vcmask 7168   ;;  %vm80_vm6 = vcmask 0   ;;  %s176_s17 = sshll.u32 %s254_s1, 4  ;;  %s178_s20 = sshll.u32 %s295_s2, 4  ;;  %s177_s17 = int_to_ptr.vmem [resolvable:$true] %s176_s17  ;;  %s179_s20 = int_to_ptr.hbm [resolvable:$true] %s178_s20 }
   0x6   :  { %v203_v10 = vcvt.f32.s32 %v202_v7  ;;  %v207_v13 = vsel %vm204_vm2, %v205_v8, %v206_v9  ;;  %v108_v17 = vand.u32 127, %v107_v15  ;;  %v253_v50 = vmov 0.0  }
   0x7   :  { %v208_v14 = vcvt.f32.s32 %v207_v13  ;;  %81 = vst.msk [vmem:[#allocation2] sm:$0x1] %vm80_vm6, %v253_v50 }
   0x8   :  { %110 = vperm.xlu1 %215, %v203_v10  }
   0xc   :  { %93 = vmax.xlane.f32.xlu0 %v92_v12 }
   0xe   :  { %v145_v58 = vld [vmem:[#allocation2] sm:$0x1] }
  0x10   :  { %113 = vperm.xlu1 %215, %v208_v14  }
  0x77   :  { %v91_v16 = vpop.xlane.xlu0 %90 }
  0x78   :  { %v95_v18 = vsub.f32 %v82_v0, %v91_v16 }
  0x7a   :  { %v97_v19 = vmul.f32 1.442695, %v95_v18  ;;  %v111_v20 = vpop.permute.xlu1 %110 }
  0x7b   :  { %vm115_vm3 = vcmp.eq.s32.totalorder %v108_v17, %v111_v20 }
  0x7c   :  { %217 = vpow2.f32 %v97_v19  ;;  %v117_v21 = vsel %vm115_vm3, %v95_v18, 0.0 }
  0x7d   :  { %v119_v22 = vsel %vm88_vm0, %v117_v21, 0.0 }
  0x7e   :  { %120 = vadd.xlane.f32.xlu0 %v119_v22 }
  0x7f   :  { %v94_v23 = vpop.xlane.xlu0 %93 }
  0x80   :  { %v96_v24 = vsub.f32 %v83_v11, %v94_v23 }
  0x82   :  { %v218_v25 = vpop.eup %217  ;;  %v99_v26 = vmul.f32 1.442695, %v96_v24  ;;  %v114_v27 = vpop.permute.xlu1 %113 }
  0x83   :  { %vm116_vm4 = vcmp.eq.s32.totalorder %v108_v17, %v114_v27  ;;  %v101_v28 = vsel %vm88_vm0, %v218_v25, 0.0 }
  0x84   :  { %219 = vpow2.f32 %v99_v26  ;;  %102 = vadd.xlane.f32.xlu2 %v101_v28  ;;  %v118_v29 = vsel %vm116_vm4, %v96_v24, 0.0 }
  0x85   :  { %v122_v30 = vsel %vm88_vm0, %v118_v29, 0.0 }
  0x86   :  { %123 = vadd.xlane.f32.xlu1 %v122_v30 }
  0x8a   :  { %v220_v31 = vpop.eup %219 }
  0x8b   :  { %v104_v32 = vsel %vm88_vm0, %v220_v31, 0.0 }
  0x8c   :  { %105 = vadd.xlane.f32.xlu2 %v104_v32 }
  0xf1   :  { %v121_v37 = vpop.xlane.xlu0 %120 }
  0xf7   :  { %v103_v33 = vpop.xlane.xlu2 %102 }
  0xf8   :  { %221 = vlog2.f32 %v103_v33 }
  0xf9   :  { %v124_v42 = vpop.xlane.xlu1 %123 }
  0xfe   :  { %v222_v34 = vpop.eup %221 }
  0xff   :  { %v126_v35 = vmul.f32 0.6931472, %v222_v34  ;;  %v106_v36 = vpop.xlane.xlu2 %105 }
 0x100   :  { %223 = vlog2.f32 %v106_v36 }
 0x101   :  { %v129_v38 = vsub.f32 %v126_v35, %v121_v37 }
 0x103   :  { %v131_v39 = vmul.f32 %v129_v38, %v84_v1 }
 0x105   :  { %148 = vrot.lane.b32.xlu2 %v131_v39, %s252_s0 }
 0x106   :  { %v224_v40 = vpop.eup %223 }
 0x107   :  { %v128_v41 = vmul.f32 0.6931472, %v224_v40 }
 0x109   :  { %v130_v43 = vsub.f32 %v128_v41, %v124_v42 }
 0x10b   :  { %v132_v44 = vmul.f32 %v130_v43, %v85_v6 }
 0x10d   :  { %150 = vrot.lane.b32.xlu0 %v132_v44, %s252_s0 }
 0x15f   :  { %v149_v45 = vpop.permute.xlu2 %148 }
 0x160   :  { %v155_v47 = vsel %vm154_vm5, %v149_v45, 0.0 }
 0x17f   :  { %v151_v46 = vpop.permute.xlu0 %150 }
 0x180   :  { %v156_v48 = vsel %vm154_vm5, %v151_v46, 0.0 }
 0x181   :  { %v157_v49 = vadd.f32 %v156_v48, %v155_v47 }
 0x183   :  { %158 = vadd.xlane.f32.xlu2 %v157_v49 }
 0x1f6   :  { %v159_v51 = vpop.xlane.xlu2 %158 }
 0x1f7   :  { %v160_v52 = vrot.slane %v159_v51, 4 }
 0x1f9   :  { %v161_v53 = vadd.f32 %v160_v52, %v159_v51 }
 0x1fb   :  { %v162_v54 = vrot.slane %v161_v53, 2 }
 0x1fd   :  { %v163_v55 = vadd.f32 %v162_v54, %v161_v53 }
 0x1ff   :  { %v164_v56 = vrot.slane %v163_v55, 1 }
 0x201   :  { %v165_v57 = vadd.f32 %v164_v56, %v163_v55 }
 0x203   :  { %209 = vpush %v165_v57 }
 0x234   :  { %s210_s21 = spop %209 }
 0x235   :  { %v167_v59 = vstv %s210_s21 }
 0x236   :  { %v168_v60 = vadd.f32 %v167_v59, %v145_v58 }
 0x238   :  { %170 = vst.msk [vmem:[#allocation2] sm:$0x1] %vm80_vm6, %v168_v60 }
 0x239   :  { %181 = dma.vmem_to_hbm [thread:$0]  %s177_s17, 16, %s179_s20, [#allocation3]  }
 0x23a   :  { %249 = dma.done.wait [#allocation3], 16  }
 0x23b   :  { %250 = vsyncadd [#allocation3], 4294967280 }
 0x23c   :  { %186 = vsyncpa [#allocation3], 1 }

</bundles_post_ra>
